<compile_context>
chip_gen: v5e
topology: v5e:2x2
jax: 0.10.0
libtpu: 0.0.40
codegen_flags: <defaults>
</compile_context>

<pallas_src>
import jax
import jax.numpy as jnp
from jax.experimental import pallas as pl
from jax.experimental.pallas import tpu as pltpu


# ---------------------------------------------------------------------------
# Fused kernel: backbone stand-in + two-stage head, one batch element per
# grid step.
#   x_ref  : (1, Cin, HW)     one sample, channels on sublanes, pixels on lanes
#   ws_ref : (F, Cin)         1x1-conv ("stem") weight, pre-transposed
#   bs_ref : (F, 1)           stem bias (column)
#   wh_ref : (4*C + 4, F)     [4 digit heads | digit-count head], transposed
#   bh_ref : (4*C + 4, 1)     matching biases (column)
# outputs:
#   final_ref : (1, C, 1)     logits of the selected digit-specific head
#   dcl_ref   : (1, 4, 1)     digit-count logits
# ---------------------------------------------------------------------------
def fused_ocr_kernel(x_ref, ws_ref, bs_ref, wh_ref, bh_ref, final_ref, dcl_ref):
    C = final_ref.shape[1]

    # ---- backbone stand-in: 1x1 conv (pointwise matmul) + ReLU + avg pool --
    x = x_ref[0]                                                # (Cin, HW)
    h = jnp.dot(ws_ref[...], x,
                preferred_element_type=jnp.float32)             # (F, HW)
    h = jnp.maximum(h + bs_ref[...], 0.0)                       # bias + ReLU
    pooled = jnp.mean(h, axis=1, keepdims=True)                 # (F, 1)

    # ---- two-stage head: one matmul for all 5 linear classifiers ----------
    logits = jnp.dot(wh_ref[...], pooled,
                     preferred_element_type=jnp.float32) + bh_ref[...]  # (4C+4,1)

    dcl = logits[4 * C:4 * C + 4, :]                            # (4, 1)
    dcl_ref[0] = dcl

    # argmax over the 4 digit-count logits (softmax dropped: it is monotone),
    # first-max tie-breaking to match torch.argmax.
    m = jnp.max(dcl, axis=0, keepdims=True)                     # (1, 1)
    idx = jax.lax.broadcasted_iota(jnp.int32, dcl.shape, 0)     # (4, 1)
    pred = jnp.min(jnp.where(dcl >= m, idx, jnp.int32(4)),
                   axis=0, keepdims=True)                       # (1, 1)

    # per-sample classifier selection: masked sum over the 4 C-wide slices.
    final = jnp.zeros((C, 1), jnp.float32)
    for k in range(4):                                          # static unroll
        sel = (pred == k).astype(jnp.float32)                   # (1, 1)
        final = final + sel * logits[k * C:(k + 1) * C, :]      # (C, 1)
    final_ref[0] = final


# ---------------------------------------------------------------------------
# Wrapper
# ---------------------------------------------------------------------------
def two_stage_ocr_forward(x_nchw, params):
    B, Cin, H, W = x_nchw.shape
    HW = H * W
    F = params["w_stem"].shape[1]
    C = params["wk"].shape[2]

    # One-time layout prep on tiny weight arrays (plain JAX, outside kernel).
    x3 = x_nchw.reshape(B, Cin, HW)                         # no transpose
    w_stem_t = params["w_stem"].T                           # (F, Cin)
    b_stem_col = params["b_stem"].reshape(F, 1)             # (F, 1)
    wk_t = params["wk"].transpose(0, 2, 1).reshape(4 * C, F)    # (4C, F)
    w_head_t = jnp.concatenate([wk_t, params["wc"].T], axis=0)  # (4C+4, F)
    b_head_col = jnp.concatenate(
        [params["bk"].reshape(4 * C, 1), params["bc"].reshape(4, 1)],
        axis=0)                                             # (4C+4, 1)

    final_t, dcl_t = pl.pallas_call(
        fused_ocr_kernel,
        out_shape=(
            jax.ShapeDtypeStruct((B, C, 1), jnp.float32),
            jax.ShapeDtypeStruct((B, 4, 1), jnp.float32),
        ),
        grid_spec=pltpu.PrefetchScalarGridSpec(
            num_scalar_prefetch=0,
            grid=(B,),
            in_specs=[
                pl.BlockSpec((1, Cin, HW), lambda i: (i, 0, 0)),
                pl.BlockSpec((F, Cin), lambda i: (0, 0)),
                pl.BlockSpec((F, 1), lambda i: (0, 0)),
                pl.BlockSpec((4 * C + 4, F), lambda i: (0, 0)),
                pl.BlockSpec((4 * C + 4, 1), lambda i: (0, 0)),
            ],
            out_specs=[
                pl.BlockSpec((1, C, 1), lambda i: (i, 0, 0)),
                pl.BlockSpec((1, 4, 1), lambda i: (i, 0, 0)),
            ],
        ),
        compiler_params=pltpu.CompilerParams(
            dimension_semantics=("parallel",)),
    )(x3, w_stem_t, b_stem_col, w_head_t, b_head_col)

    final_logits = final_t[:, :, 0]           # (B, C)
    digit_count_logits = dcl_t[:, :, 0]       # (B, 4)
    return final_logits, digit_count_logits


# ---------------------------------------------------------------------------
# Pure-JAX reference (faithful to the PyTorch forward, incl. softmax->argmax)
# ---------------------------------------------------------------------------
def reference_forward(x_nchw, params):
    B, Cin, H, W = x_nchw.shape
    x = jnp.transpose(x_nchw, (0, 2, 3, 1)).reshape(B, H * W, Cin)
    h = jnp.maximum(x @ params["w_stem"] + params["b_stem"], 0.0)
    feats = h.mean(axis=1)                                          # (B, F)
    dcl = feats @ params["wc"] + params["bc"]                       # (B, 4)
    pred = jnp.argmax(jax.nn.softmax(dcl, axis=1), axis=1)          # (B,)
    allk = jnp.einsum("bf,kfc->bkc", feats, params["wk"]) + params["bk"][None]
    final = jnp.take_along_axis(allk, pred[:, None, None], axis=1)[:, 0]
    return final, dcl


if __name__ == "__main__":
    # Small shapes consistent with the module's forward (NCHW like PyTorch).
    B, Cin, H, W = 2, 4, 16, 16
    FEAT = 32                          # stand-in for EfficientNet in_features
    NUM_CLASSES = 10

    key = jax.random.PRNGKey(0)
    k = jax.random.split(key, 8)
    x = jax.random.normal(k[0], (B, Cin, H, W), jnp.float32)

    # nn.Linear(in, out) is y = x @ W.T + b; weights stored here already
    # transposed to (in, out).
    params = {
        "w_stem": jax.random.normal(k[1], (Cin, FEAT), jnp.float32) * 0.1,
        "b_stem": jax.random.normal(k[2], (1, FEAT), jnp.float32) * 0.1,
        "wc":     jax.random.normal(k[3], (FEAT, 4), jnp.float32) * 0.1,
        "bc":     jax.random.normal(k[4], (1, 4), jnp.float32) * 0.1,
        "wk":     jax.random.normal(k[5], (4, FEAT, NUM_CLASSES), jnp.float32) * 0.1,
        "bk":     jax.random.normal(k[6], (4, NUM_CLASSES), jnp.float32) * 0.1,
    }

    final_logits, digit_count_logits = jax.block_until_ready(
        two_stage_ocr_forward(x, params))

    ref_final, ref_dcl = reference_forward(x, params)
    assert final_logits.shape == (B, NUM_CLASSES)
    assert digit_count_logits.shape == (B, 4)
    assert jnp.allclose(final_logits, ref_final, atol=1e-4, rtol=1e-4)
    assert jnp.allclose(digit_count_logits, ref_dcl, atol=1e-4, rtol=1e-4)

    print("KERNEL_OK")
</pallas_src>

<mosaic_0001>
module attributes {stable_mosaic.version = 11 : i64} {
  func.func @fused_ocr_kernel(%arg0: i32, %arg1: memref<1x4x256xf32, #tpu.memory_space<vmem>>, %arg2: memref<32x4xf32, #tpu.memory_space<vmem>>, %arg3: memref<32x1xf32, #tpu.memory_space<vmem>>, %arg4: memref<44x32xf32, #tpu.memory_space<vmem>>, %arg5: memref<44x1xf32, #tpu.memory_space<vmem>>, %arg6: memref<1x10x1xf32, #tpu.memory_space<vmem>>, %arg7: memref<1x4x1xf32, #tpu.memory_space<vmem>>) attributes {dimension_semantics = [#tpu.dimension_semantics<parallel>], iteration_bounds = array<i64: 2>, scalar_prefetch = 0 : i64, scratch_operands = 0 : i64, tpu.core_type = #tpu.core_type<tc>, window_params = [{transform_indices = @transform_0, window_bounds = array<i64: 1, 4, 256>}, {pipeline_mode = #tpu.pipeline_mode<synchronous>, transform_indices = @transform_1, window_bounds = array<i64: 32, 4>}, {pipeline_mode = #tpu.pipeline_mode<synchronous>, transform_indices = @transform_2, window_bounds = array<i64: 32, 1>}, {pipeline_mode = #tpu.pipeline_mode<synchronous>, transform_indices = @transform_3, window_bounds = array<i64: 44, 32>}, {pipeline_mode = #tpu.pipeline_mode<synchronous>, transform_indices = @transform_4, window_bounds = array<i64: 44, 1>}, {transform_indices = @transform_5, window_bounds = array<i64: 1, 10, 1>}, {transform_indices = @transform_6, window_bounds = array<i64: 1, 4, 1>}]} {
    %c0 = arith.constant 0 : index
    %c0_0 = arith.constant 0 : index
    %c0_1 = arith.constant 0 : index
    %0 = vector.load %arg1[%c0, %c0_0, %c0_1] : memref<1x4x256xf32, #tpu.memory_space<vmem>>, vector<1x4x256xf32>
    %1 = vector.shape_cast %0 : vector<1x4x256xf32> to vector<4x256xf32>
    %c0_2 = arith.constant 0 : index
    %c0_3 = arith.constant 0 : index
    %2 = vector.load %arg2[%c0_2, %c0_3] : memref<32x4xf32, #tpu.memory_space<vmem>>, vector<32x4xf32>
    %cst = arith.constant dense<0.000000e+00> : vector<32x256xf32>
    %3 = tpu.matmul %2, %1, %cst {dimension_numbers = #tpu.dot_dimension_numbers<[1], [0], [0], [1], [0, 0, 1, 1], [], []>} : vector<32x4xf32>, vector<4x256xf32>, vector<32x256xf32> -> vector<32x256xf32>
    %c0_4 = arith.constant 0 : index
    %c0_5 = arith.constant 0 : index
    %4 = vector.load %arg3[%c0_4, %c0_5] : memref<32x1xf32, #tpu.memory_space<vmem>>, vector<32x1xf32>
    %5 = vector.broadcast %4 : vector<32x1xf32> to vector<32x256xf32>
    %6 = arith.addf %3, %5 : vector<32x256xf32>
    %cst_6 = arith.constant 0.000000e+00 : f32
    %7 = vector.broadcast %cst_6 : f32 to vector<32x256xf32>
    %8 = arith.maximumf %6, %7 : vector<32x256xf32>
    %cst_7 = arith.constant dense<0.000000e+00> : vector<32xf32>
    %9 = vector.multi_reduction <add>, %8, %cst_7 [1] : vector<32x256xf32> to vector<32xf32>
    %10 = vector.shape_cast %9 : vector<32xf32> to vector<32x1xf32>
    %cst_8 = arith.constant 2.560000e+02 : f32
    %11 = vector.broadcast %cst_8 : f32 to vector<32x1xf32>
    %12 = arith.divf %10, %11 : vector<32x1xf32>
    %c0_9 = arith.constant 0 : index
    %c0_10 = arith.constant 0 : index
    %13 = vector.load %arg4[%c0_9, %c0_10] : memref<44x32xf32, #tpu.memory_space<vmem>>, vector<44x32xf32>
    %cst_11 = arith.constant dense<0.000000e+00> : vector<44x1xf32>
    %14 = tpu.matmul %13, %12, %cst_11 {dimension_numbers = #tpu.dot_dimension_numbers<[1], [0], [0], [1], [0, 0, 1, 1], [], []>} : vector<44x32xf32>, vector<32x1xf32>, vector<44x1xf32> -> vector<44x1xf32>
    %c0_12 = arith.constant 0 : index
    %c0_13 = arith.constant 0 : index
    %15 = vector.load %arg5[%c0_12, %c0_13] : memref<44x1xf32, #tpu.memory_space<vmem>>, vector<44x1xf32>
    %16 = arith.addf %14, %15 : vector<44x1xf32>
    %17 = vector.extract_strided_slice %16 {offsets = [40, 0], sizes = [4, 1], strides = [1, 1]} : vector<44x1xf32> to vector<4x1xf32>
    %c0_14 = arith.constant 0 : index
    %c0_15 = arith.constant 0 : index
    %c0_16 = arith.constant 0 : index
    %18 = vector.load %arg7[%c0_14, %c0_15, %c0_16] : memref<1x4x1xf32, #tpu.memory_space<vmem>>, vector<1x4x1xf32>
    %19 = vector.shape_cast %18 : vector<1x4x1xf32> to vector<4x1xf32>
    %20 = vector.shape_cast %17 : vector<4x1xf32> to vector<1x4x1xf32>
    tpu.vector_store %arg7[%c0_14, %c0_15, %c0_16], %20 {strides = array<i32>} : memref<1x4x1xf32, #tpu.memory_space<vmem>>, vector<1x4x1xf32>,
    %cst_17 = arith.constant dense<0xFF800000> : vector<1xf32>
    %21 = vector.multi_reduction <maximumf>, %17, %cst_17 [0] : vector<4x1xf32> to vector<1xf32>
    %22 = vector.shape_cast %21 : vector<1xf32> to vector<1x1xf32>
    %23 = tpu.iota {dimensions = array<i32: 0>} : vector<4x1xi32>
    %24 = vector.broadcast %22 : vector<1x1xf32> to vector<4x1xf32>
    %25 = arith.cmpf oge, %17, %24 : vector<4x1xf32>
    %c4_i32 = arith.constant 4 : i32
    %26 = vector.broadcast %c4_i32 : i32 to vector<4x1xi32>
    %27 = arith.select %25, %23, %26 : vector<4x1xi1>, vector<4x1xi32>
    %cst_18 = arith.constant dense<2147483647> : vector<1xi32>
    %28 = vector.multi_reduction <minsi>, %27, %cst_18 [0] : vector<4x1xi32> to vector<1xi32>
    %29 = vector.shape_cast %28 : vector<1xi32> to vector<1x1xi32>
    %cst_19 = arith.constant 0.000000e+00 : f32
    %30 = vector.broadcast %cst_19 : f32 to vector<10x1xf32>
    %c0_i32 = arith.constant 0 : i32
    %31 = vector.broadcast %c0_i32 : i32 to vector<1x1xi32>
    %32 = arith.cmpi eq, %29, %31 : vector<1x1xi32>
    %33 = arith.extui %32 : vector<1x1xi1> to vector<1x1xi32>
    %34 = arith.sitofp %33 : vector<1x1xi32> to vector<1x1xf32>
    %35 = vector.extract_strided_slice %16 {offsets = [0, 0], sizes = [10, 1], strides = [1, 1]} : vector<44x1xf32> to vector<10x1xf32>
    %36 = vector.broadcast %34 : vector<1x1xf32> to vector<10x1xf32>
    %37 = arith.mulf %36, %35 : vector<10x1xf32>
    %38 = arith.addf %30, %37 : vector<10x1xf32>
    %c1_i32 = arith.constant 1 : i32
    %39 = vector.broadcast %c1_i32 : i32 to vector<1x1xi32>
    %40 = arith.cmpi eq, %29, %39 : vector<1x1xi32>
    %41 = arith.extui %40 : vector<1x1xi1> to vector<1x1xi32>
    %42 = arith.sitofp %41 : vector<1x1xi32> to vector<1x1xf32>
    %43 = vector.extract_strided_slice %16 {offsets = [10, 0], sizes = [10, 1], strides = [1, 1]} : vector<44x1xf32> to vector<10x1xf32>
    %44 = vector.broadcast %42 : vector<1x1xf32> to vector<10x1xf32>
    %45 = arith.mulf %44, %43 : vector<10x1xf32>
    %46 = arith.addf %38, %45 : vector<10x1xf32>
    %c2_i32 = arith.constant 2 : i32
    %47 = vector.broadcast %c2_i32 : i32 to vector<1x1xi32>
    %48 = arith.cmpi eq, %29, %47 : vector<1x1xi32>
    %49 = arith.extui %48 : vector<1x1xi1> to vector<1x1xi32>
    %50 = arith.sitofp %49 : vector<1x1xi32> to vector<1x1xf32>
    %51 = vector.extract_strided_slice %16 {offsets = [20, 0], sizes = [10, 1], strides = [1, 1]} : vector<44x1xf32> to vector<10x1xf32>
    %52 = vector.broadcast %50 : vector<1x1xf32> to vector<10x1xf32>
    %53 = arith.mulf %52, %51 : vector<10x1xf32>
    %54 = arith.addf %46, %53 : vector<10x1xf32>
    %c3_i32 = arith.constant 3 : i32
    %55 = vector.broadcast %c3_i32 : i32 to vector<1x1xi32>
    %56 = arith.cmpi eq, %29, %55 : vector<1x1xi32>
    %57 = arith.extui %56 : vector<1x1xi1> to vector<1x1xi32>
    %58 = arith.sitofp %57 : vector<1x1xi32> to vector<1x1xf32>
    %59 = vector.extract_strided_slice %16 {offsets = [30, 0], sizes = [10, 1], strides = [1, 1]} : vector<44x1xf32> to vector<10x1xf32>
    %60 = vector.broadcast %58 : vector<1x1xf32> to vector<10x1xf32>
    %61 = arith.mulf %60, %59 : vector<10x1xf32>
    %62 = arith.addf %54, %61 : vector<10x1xf32>
    %c0_20 = arith.constant 0 : index
    %c0_21 = arith.constant 0 : index
    %c0_22 = arith.constant 0 : index
    %63 = vector.load %arg6[%c0_20, %c0_21, %c0_22] : memref<1x10x1xf32, #tpu.memory_space<vmem>>, vector<1x10x1xf32>
    %64 = vector.shape_cast %63 : vector<1x10x1xf32> to vector<10x1xf32>
    %65 = vector.shape_cast %62 : vector<10x1xf32> to vector<1x10x1xf32>
    tpu.vector_store %arg6[%c0_20, %c0_21, %c0_22], %65 {strides = array<i32>} : memref<1x10x1xf32, #tpu.memory_space<vmem>>, vector<1x10x1xf32>,
    return
  }
  func.func @transform_0(%arg0: i32) -> (i32, i32, i32) {
    %c0_i32 = arith.constant 0 : i32
    %c0_i32_0 = arith.constant 0 : i32
    %c0_i32_1 = arith.constant 0 : i32
    return %arg0, %c0_i32, %c0_i32_0 : i32, i32, i32
  }
  func.func @transform_1(%arg0: i32) -> (i32, i32) {
    %c0_i32 = arith.constant 0 : i32
    %c0_i32_0 = arith.constant 0 : i32
    %c0_i32_1 = arith.constant 0 : i32
    return %c0_i32, %c0_i32_0 : i32, i32
  }
  func.func @transform_2(%arg0: i32) -> (i32, i32) {
    %c0_i32 = arith.constant 0 : i32
    %c0_i32_0 = arith.constant 0 : i32
    %c0_i32_1 = arith.constant 0 : i32
    return %c0_i32, %c0_i32_0 : i32, i32
  }
  func.func @transform_3(%arg0: i32) -> (i32, i32) {
    %c0_i32 = arith.constant 0 : i32
    %c0_i32_0 = arith.constant 0 : i32
    %c0_i32_1 = arith.constant 0 : i32
    return %c0_i32, %c0_i32_0 : i32, i32
  }
  func.func @transform_4(%arg0: i32) -> (i32, i32) {
    %c0_i32 = arith.constant 0 : i32
    %c0_i32_0 = arith.constant 0 : i32
    %c0_i32_1 = arith.constant 0 : i32
    return %c0_i32, %c0_i32_0 : i32, i32
  }
  func.func @transform_5(%arg0: i32) -> (i32, i32, i32) {
    %c0_i32 = arith.constant 0 : i32
    %c0_i32_0 = arith.constant 0 : i32
    %c0_i32_1 = arith.constant 0 : i32
    return %arg0, %c0_i32, %c0_i32_0 : i32, i32, i32
  }
  func.func @transform_6(%arg0: i32) -> (i32, i32, i32) {
    %c0_i32 = arith.constant 0 : i32
    %c0_i32_0 = arith.constant 0 : i32
    %c0_i32_1 = arith.constant 0 : i32
    return %arg0, %c0_i32, %c0_i32_0 : i32, i32, i32
  }
}

</mosaic_0001>

<bundles_post_ra>
// kernel: tpu_custom_call.1
= control target key start
LH: loop header
LB: loop body
LE: loop exit
PB: predicated region body
PF: predicated region fallthrough
CT: control target
= control target key end

     0   :  { %s732_s21 = smov 0   ;;  %s823_s0 = inlined_call_operand.vmem [shape: f32[2,4,256], index: 0, kind: input, shape index: {}]   ;;  %s824_s1 = inlined_call_operand.vmem [shape: f32[32,4], index: 1, kind: input, shape index: {}]   ;;  %s825_s2 = inlined_call_operand.vmem [shape: f32[32,1], index: 2, kind: input, shape index: {}]   ;;  %s826_s3 = inlined_call_operand.vmem [shape: f32[44,32], index: 3, kind: input, shape index: {}]   ;;  %s827_s4 = inlined_call_operand.vmem [shape: f32[44,1], index: 4, kind: input, shape index: {}]   ;;  %s828_s5 = inlined_call_operand.vmem [shape: f32[2,10,1], index: 5, kind: output, shape index: {0}]   ;;  %s829_s6 = inlined_call_operand.vmem [shape: f32[2,4,1], index: 6, kind: output, shape index: {1}]  }
   0x1 LB: > { %s633_s22 = sadd.s32 4294967295, %s692_s21   ;;  %p637_p0 = scmp.ge.s32.totalorder %s692_s21, 1  ;;  %s692_s21 = sphi %s732_s21, %s17_s21  }
   0x2   : > { %p215_p1 = scmp.lt.s32.totalorder %s692_s21, 3 }
   0x4   : > { %p216_p2 = pnand %p637_p0, %p215_p1 }
   0x5   : > { %p249_p3 = scmp.lt.s32.totalorder (!%p216_p2), %s633_s22, 1 }
   0x6   : > { %219 = sbr.rel (%p216_p2) target bundleno = 495 (0x1ef), region = 40 }
   0xb   : > { %v269_v0 = vld [vmem:[%s825_s2 + $0x8] sm:$0xff]  ;;  %v694_v1 = vmov 0   ;;  %s831_s22 = smov (!%p249_p3, %s633_s22), 1  ;;  %v271_v2 = vld [vmem:[%s825_s2 + $0x18] sm:$0xff]  ;;  %v268_v4 = vld [vmem:[%s825_s2] sm:$0xff]  ;;  %vm309_vm0 = vcmask 1043456  }
   0xc   : > { %683 = vset.pattern.permute.xlu1 %v694_v1  ;;  %682 = vset.pattern.permute.xlu0 %v694_v1  ;;  %s665_s27 = sshll.u32 %s831_s22, 3  ;;  %v270_v5 = vld [vmem:[%s825_s2 + $0x10] sm:$0xff]  ;;  %v264_v6 = vld [vmem:[%s824_s1] sm:$0xff]  ;;  %vm296_vm1 = vcmask 31744   ;;  %v265_v9 = vld [vmem:[%s824_s1 + $0x8] sm:$0xff]  ;;  %v695_v44 = vmov 256.0  }
   0xd   : > { %279 = vperm.xlu1 %683, %v269_v0   ;;  %289 = vperm.xlu0 %682, %v271_v2   ;;  %s253_s30 = scalar_lea.vmem %s823_s0, %s665_s27  ;;  %v266_v10 = vld [vmem:[%s824_s1 + $0x10] sm:$0xff]  ;;  %v267_v11 = vld [vmem:[%s824_s1 + $0x18] sm:$0xff]  ;;  %684 = vrcp.f32 %v695_v44  ;;  %v407_v59 = vld [vmem:[%s826_s3 + $0x20] sm:$0xff]  ;;  %vm415_vm3 = vcmask 261120   ;;  %s642_s9 = sshll.u32 %s831_s22, 2  ;;  %vm469_vm4 = vcmask 3072  }
   0xe   : > { %v263_v3 = vld [vmem:[%s253_s30] sm:$0xff]  ;;  %v408_v61 = vld [vmem:[%s826_s3 + $0x28] sm:$0xf]  ;;  %v405_v63 = vld [vmem:[%s826_s3 + $0x10] sm:$0xff]  ;;  %s262_s14 = scalar_lea.vmem %s829_s6, %s642_s9  ;;  %vm506_vm13 = vcmask 1045504   ;;  %s666_s27 = sshll.u32 %s831_s22, 4 }
   0xf   : > { %293 = vst [vmem:[#allocation1] ss:$2 sm:$0xff] %v263_v3  ;;  %v403_v60 = vld [vmem:[%s826_s3] sm:$0xff]  ;;  %v404_v62 = vld [vmem:[%s826_s3 + $0x8] sm:$0xff]  ;;  %v406_v0 = vld [vmem:[%s826_s3 + $0x18] sm:$0xff]  ;;  %vm535_vm14 = vcmask 1041408   ;;  %s258_s30 = scalar_lea.vmem %s828_s5, %s666_s27 }
  0x10   : > { %v414_v3 = vld [vmem:[%s827_s4 + $0x28] sm:$0xf]  ;;  %vm545_vm15 = vcmask 1024  }
  0x13   : > { %v685_v45 = vpop.eup %684 }
  0x14   : > { %v393_v46 = vmul.f32 256.0, %v685_v45  ;;  %vm397_vm2 = vweird.f32 %v685_v45 }
  0x15   : > { %274 = vperm.xlu1 %683, %v268_v4   ;;  %284 = vperm.xlu0 %682, %v270_v5  }
  0x16   : > { %v294_v7 = vld.sshfl [vmem:[#allocation1] sm:$0xff pattern:$0x75316420]  ;;  %v295_v8 = vld.sshfl [vmem:[#allocation1 + $0x8] sm:$0xff pattern:$0x75316420] }
  0x17   : > { %643 = vmatpush.msk.msra.mxu0 %vm309_vm0, %v294_v7  ;;  %648 = vmatpush.msk.msra.mxu1 %vm309_vm0, %v295_v8  ;;  %v394_v47 = vsub.f32 1.0, %v393_v46 }
  0x18   : > { %644 = vmatmul.msk.f32.vlgmr.msra.gmra.mxu0 %vm296_vm1, %v264_v6  ;;  %649 = vmatmul.msk.f32.vlgmr.msra.gmra.mxu1 %vm296_vm1, %v264_v6 }
  0x19   : > { %v395_v48 = vmul.f32 %v685_v45, %v394_v47 }
  0x1b   : > { %v396_v49 = vadd.f32 %v685_v45, %v395_v48 }
  0x1d   : > { %v398_v50 = vsel %vm397_vm2, %v685_v45, %v396_v49 }
  0x20   : > { %645 = vmatmul.msk.f32.gmra.mxu0 %vm296_vm1, %v265_v9  ;;  %650 = vmatmul.msk.f32.gmra.mxu1 %vm296_vm1, %v265_v9 }
  0x28   : > { %646 = vmatmul.msk.f32.gmra.mxu0 %vm296_vm1, %v266_v10  ;;  %651 = vmatmul.msk.f32.gmra.mxu1 %vm296_vm1, %v266_v10 }
  0x30   : > { %647 = vmatmul.msk.f32.gmra.mxu0 %vm296_vm1, %v267_v11  ;;  %652 = vmatmul.msk.f32.gmra.mxu1 %vm296_vm1, %v267_v11  ;;  %v478_v11 = vlaneseq  ;;  %vm543_vm1 = vcmask 7168  }
  0x7f   : > { %v280_v12 = vpop.permute.xlu1 %279  ;;  %v290_v28 = vpop.permute.xlu0 %289 }
  0x87   : > { %v275_v13 = vpop.permute.xlu1 %274  ;;  %v285_v35 = vpop.permute.xlu0 %284 }
  0x95   : > { %v331_v14 = vpop.f32.mrf.mxu0  ;;  %v360_v15 = vpop.f32.mrf.mxu1 }
  0x96   : > { %v332_v16 = vadd.f32 %v331_v14, %v275_v13  ;;  %v361_v17 = vadd.f32 %v360_v15, %v275_v13  ;;  %v479_v14 = vshrl.u32 %v478_v11, 7 }
  0x98   : > { %v372_v18 = vmax.f32 %v332_v16, 0.0  ;;  %v373_v19 = vmax.f32 %v361_v17, 0.0 }
  0x9a   : > { %v380_v20 = vadd.f32 %v373_v19, %v372_v18 }
  0x9c   : > { %381 = vadd.xlane.f32.xlu1 %v380_v20 }
  0x9d   : > { %v334_v21 = vpop.f32.mrf.mxu0  ;;  %v363_v22 = vpop.f32.mrf.mxu1 }
  0x9e   : > { %v335_v23 = vadd.f32 %v334_v21, %v280_v12  ;;  %v364_v24 = vadd.f32 %v363_v22, %v280_v12  ;;  %v413_v22 = vld [vmem:[%s827_s4 + $0x20] sm:$0xff] }
  0xa0   : > { %v374_v25 = vmax.f32 %v335_v23, 0.0  ;;  %v375_v26 = vmax.f32 %v364_v24, 0.0 }
  0xa2   : > { %v383_v27 = vadd.f32 %v375_v26, %v374_v25  ;;  %v410_v25 = vld [vmem:[%s827_s4 + $0x8] sm:$0xff]  ;;  %v411_v26 = vld [vmem:[%s827_s4 + $0x10] sm:$0xff] }
  0xa4   : > { %384 = vadd.xlane.f32.xlu0 %v383_v27  ;;  %v412_v27 = vld [vmem:[%s827_s4 + $0x18] sm:$0xff] }
  0xa5   : > { %v337_v29 = vpop.f32.mrf.mxu0  ;;  %v366_v30 = vpop.f32.mrf.mxu1 }
  0xa6   : > { %v338_v38 = vadd.f32 %v337_v29, %v285_v35  ;;  %v367_v39 = vadd.f32 %v366_v30, %v285_v35  ;;  %v409_v30 = vld [vmem:[%s827_s4] sm:$0xff]  ;;  %v696_v35 = vmov 0.0  }
  0xa8   : > { %v376_v41 = vmax.f32 %v338_v38, 0.0  ;;  %v377_v42 = vmax.f32 %v367_v39, 0.0 }
  0xaa   : > { %v386_v43 = vadd.f32 %v377_v42, %v376_v41 }
  0xad   : > { %v340_v31 = vpop.f32.mrf.mxu0  ;;  %v369_v32 = vpop.f32.mrf.mxu1 }
  0xae   : > { %v341_v33 = vadd.f32 %v340_v31, %v290_v28  ;;  %v370_v34 = vadd.f32 %v369_v32, %v290_v28 }
  0xb0   : > { %v378_v36 = vmax.f32 %v341_v33, 0.0  ;;  %v379_v37 = vmax.f32 %v370_v34, 0.0 }
  0xb2   : > { %v389_v40 = vadd.f32 %v379_v37, %v378_v36 }
  0xb4   : > { %390 = vadd.xlane.f32.xlu2 %v389_v40 }
  0xbc   : > { %387 = vadd.xlane.f32.xlu2 %v386_v43 }
 0x10f   : > { %v382_v56 = vpop.xlane.xlu1 %381 }
 0x110   : > { %v399_v58 = vmul.f32 %v398_v50, %v382_v56 }
 0x117   : > { %v385_v53 = vpop.xlane.xlu0 %384 }
 0x118   : > { %v400_v57 = vmul.f32 %v398_v50, %v385_v53 }
 0x127   : > { %v391_v51 = vpop.xlane.xlu2 %390 }
 0x128   : > { %v402_v52 = vmul.f32 %v398_v50, %v391_v51 }
 0x12a   : > { %446 = vmatpush.msra.mxu2 %v402_v52  ;;  %667 = vmatpush.msra.mxu3 %v402_v52 }
 0x12f   : > { %v388_v54 = vpop.xlane.xlu2 %387 }
 0x130   : > { %v401_v55 = vmul.f32 %v398_v50, %v388_v54 }
 0x132   : > { %447 = vmatpush.msra.mxu2 %v401_v55  ;;  %668 = vmatpush.msra.mxu3 %v401_v55 }
 0x134   : > { %448 = vmatpush.msra.mxu2 %v400_v57  ;;  %669 = vmatpush.msra.mxu3 %v400_v57 }
 0x136   : > { %449 = vmatpush.msra.mxu2 %v399_v58  ;;  %670 = vmatpush.msra.mxu3 %v399_v58 }
 0x137   : > { %657 = vmatmul.msk.f32.vlgmr.msra.gmra.mxu3 %vm415_vm3, %v407_v59  ;;  %653 = vmatmul.msk.f32.vlgmr.msra.gmra.mxu2 %vm415_vm3, %v403_v60 }
 0x13f   : > { %658 = vmatmul.msk.f32.gmra.mxu3 %vm415_vm3, %v408_v61  ;;  %654 = vmatmul.msk.f32.gmra.mxu2 %vm415_vm3, %v404_v62 }
 0x147   : > { %655 = vmatmul.msk.f32.gmra.mxu2 %vm415_vm3, %v405_v63 }
 0x14f   : > { %656 = vmatmul.msk.f32.gmra.mxu2 %vm415_vm3, %v406_v0 }
 0x1ba   : > { %v463_v1 = vpop.f32.mrf.mxu3  ;;  %v451_v2 = vpop.f32.mrf.mxu2 }
 0x1bb   : > { %v464_v29 = vadd.f32 %v463_v1, %v413_v22  ;;  %v452_v40 = vadd.f32 %v451_v2, %v409_v30 }
 0x1c2   : > { %v466_v4 = vpop.f32.mrf.mxu3  ;;  %v454_v9 = vpop.f32.mrf.mxu2 }
 0x1c3   : > { %v467_v5 = vadd.f32 %v466_v4, %v414_v3  ;;  %v455_v32 = vadd.f32 %v454_v9, %v410_v25 }
 0x1c5   : > { %470 = vst.msk [vmem:[%s262_s14] sm:$0xf] %vm469_vm4, %v467_v5  ;;  %v471_v6 = vsel %vm469_vm4, %v467_v5, -inf }
 0x1c6   : > { %v472_v7 = vrot.slane %v471_v6, 4 }
 0x1c8   : > { %v473_v8 = vmax.f32 %v471_v6, %v472_v7 }
 0x1ca   : > { %v474_v10 = vrot.slane %v473_v8, 2  ;;  %v457_v17 = vpop.f32.mrf.mxu2 }
 0x1cb   : > { %v458_v33 = vadd.f32 %v457_v17, %v411_v26 }
 0x1cc   : > { %v475_v12 = vmax.f32 %v473_v8, %v474_v10 }
 0x1ce   : > { %v476_v13 = vrot.slane %v475_v12, 1 }
 0x1d0   : > { %v477_v15 = vmax.f32 %v475_v12, %v476_v13 }
 0x1d2   : > { %vm480_vm5 = vcmp.ge.f32.partialorder %v467_v5, %v477_v15  ;;  %v460_v28 = vpop.f32.mrf.mxu2 }
 0x1d3   : > { %v481_v16 = vsel %vm480_vm5, %v479_v14, 4  ;;  %v461_v34 = vadd.f32 %v460_v28, %v412_v27 }
 0x1d4   : > { %v482_v18 = vsel %vm469_vm4, %v481_v16, 2147483647 }
 0x1d5   : > { %v483_v19 = vrot.slane %v482_v18, 4 }
 0x1d7   : > { %vm484_vm6 = vcmp.lt.s32.totalorder %v482_v18, %v483_v19 }
 0x1d8   : > { %v485_v20 = vsel %vm484_vm6, %v482_v18, %v483_v19 }
 0x1d9   : > { %v486_v21 = vrot.slane %v485_v20, 2 }
 0x1db   : > { %vm487_vm7 = vcmp.lt.s32.totalorder %v485_v20, %v486_v21 }
 0x1dc   : > { %v488_v23 = vsel %vm487_vm7, %v485_v20, %v486_v21 }
 0x1dd   : > { %v489_v24 = vrot.slane %v488_v23, 1 }
 0x1df   : > { %vm490_vm8 = vcmp.lt.s32.totalorder %v488_v23, %v489_v24 }
 0x1e0   : > { %v491_v31 = vsel %vm490_vm8, %v488_v23, %v489_v24 }
 0x1e1   : > { %vm492_vm9 = vcmp.eq.s32.totalorder %v491_v31, 0  ;;  %vm499_vm10 = vcmp.eq.s32.totalorder %v491_v31, 1  ;;  %vm514_vm11 = vcmp.eq.s32.totalorder %v491_v31, 2  ;;  %vm528_vm12 = vcmp.eq.s32.totalorder %v491_v31, 3 }
 0x1e2   : > { %v659_v36 = vsel %vm492_vm9, 1.0, %v696_v35  ;;  %v660_v37 = vsel %vm499_vm10, 1.0, %v696_v35  ;;  %v661_v38 = vsel %vm514_vm11, 1.0, %v696_v35  ;;  %v662_v39 = vsel %vm528_vm12, 1.0, %v696_v35 }
 0x1e3   : > { %v502_v41 = vmul.f32 %v660_v37, %v455_v32  ;;  %v503_v42 = vmul.f32 %v660_v37, %v458_v33  ;;  %v517_v43 = vmul.f32 %v661_v38, %v458_v33  ;;  %v518_v44 = vmul.f32 %v661_v38, %v461_v34 }
 0x1e4   : > { %v531_v45 = vmul.f32 %v662_v39, %v461_v34  ;;  %v532_v46 = vmul.f32 %v662_v39, %v464_v29  ;;  %v496_v47 = vmul.f32 %v659_v36, %v455_v32  ;;  %v495_v50 = vmul.f32 %v659_v36, %v452_v40 }
 0x1e5   : > { %v507_v48 = vrot.slane %v502_v41, 2  ;;  %v508_v49 = vrot.slane %v503_v42, 2  ;;  %v521_v51 = vrot.slane %v517_v43, 4  ;;  %v522_v52 = vrot.slane %v518_v44, 4 }
 0x1e6   : > { %v536_v55 = vrot.slane %v531_v45, 6  ;;  %v537_v56 = vrot.slane %v532_v46, 6 }
 0x1e7   : > { %v509_v53 = vsel %vm506_vm13, %v507_v48, %v508_v49  ;;  %v513_v54 = vadd.f32 %v508_v49, %v496_v47  ;;  %v523_v58 = vsel %vm309_vm0, %v521_v51, %v522_v52 }
 0x1e8   : > { %v512_v57 = vadd.f32 %v509_v53, %v495_v50  ;;  %v538_v61 = vsel %vm535_vm14, %v536_v55, %v537_v56 }
 0x1e9   : > { %v527_v59 = vadd.f32 %v522_v52, %v513_v54 }
 0x1ea   : > { %v526_v60 = vadd.f32 %v523_v58, %v512_v57 }
 0x1eb   : > { %v542_v62 = vadd.f32 %v537_v56, %v527_v59 }
 0x1ec   : > { %v541_v63 = vadd.f32 %v538_v61, %v526_v60 }
 0x1ed   : > { %546 = vst.msk [vmem:[%s258_s30 + $0x8] sm:$0x3] %vm545_vm15, %v542_v62 }
 0x1ee   : > { %544 = vst.msk [vmem:[%s258_s30] sm:$0xff] %vm543_vm1, %v541_v63 }
 0x1ef PF: > { %s17_s21 = sadd.s32 1, %s692_s21  }
 0x1f0   : > { %p14_p4 = scmp.ge.s32.totalorder %s17_s21, 4  }
 0x1f2   :  { %16 = sbr.rel (!%p14_p4) target bundleno = 1 (0x1), region = 82 }

</bundles_post_ra>
